<compile_context>
chip_gen: v7x
topology: tpu7x:2x2x1
jax: 0.10.0
libtpu: 0.0.40
codegen_flags: <defaults>
</compile_context>

<pallas_src>
import jax
import jax.numpy as jnp
import numpy as np
from jax.experimental import pallas as pl
from jax.experimental.pallas import tpu as pltpu

# ---- module hyper-params (MultiPool defaults, scaled-down problem size) ----
IN_FEATURES = 32      # in_features  (F)
OUT_FEATURES = 1      # out_features (O)
MAX_LEVEL = 4         # max_level    (L)
NUM_G = 8             # number of 'g' (graph) nodes per instance
NUM_N = 16            # number of source nodes per level
BATCH = 8             # number of MultiPool problem instances batched per call


def multipool_kernel(a_ref, hblk_ref, w1t_ref, b1_ref, w2r_ref, b2_ref, o_ref):
    """One grid step = one problem instance.

    a_ref   : [1, G, L*N]     flattened membership (VMEM, per-step tile)
    hblk_ref: [1, L*N, L*F]   block-diagonal node features (VMEM, per-step tile)
    w1t_ref : [L*F, F]        Linear1 weight, transposed to [in, out] (resident)
    b1_ref  : [1, F]          Linear1 bias (resident)
    w2r_ref : [1, F]          Linear2 weight row (O == 1) (resident)
    b2_ref  : [1]             Linear2 bias scalar (SMEM)
    o_ref   : [1, G, 1]       per-instance output
    """
    # --- fused per-level pooling + concat: one lane-dense MXU matmul ---
    # cat[g, l*F + f] = sum_n A[l, g, n] * H[l, n, f]
    cat = jnp.dot(a_ref[0], hblk_ref[0],
                  preferred_element_type=jnp.float32)          # [G, L*F]

    # --- Linear1 + Tanh ---
    hidden = jnp.tanh(
        jnp.dot(cat, w1t_ref[...], preferred_element_type=jnp.float32)
        + b1_ref[...]
    )                                                          # [G, F]

    # --- Linear2 (O == 1): VPU multiply + lane reduce, no degenerate matmul ---
    y = jnp.sum(hidden * w2r_ref[...], axis=-1, keepdims=True) + b2_ref[0]
    o_ref[0] = y.astype(o_ref.dtype)                           # [G, 1]


def multipool_forward(a, h, w1, b1, w2, b2):
    """Batched MultiPool forward.

    a : [B, L, G, N]  0/1 membership
    h : [B, L, N, F]  node features
    w1: [F, L*F]      Linear1 weight (torch layout: [out, in])
    b1: [F]
    w2: [O, F]        Linear2 weight (torch layout), O must be 1
    b2: [O]
    returns [B, G, O] float32
    """
    B, L, G, N = a.shape
    F = h.shape[-1]
    O = w2.shape[0]
    assert O == 1, "VPU-reduce Linear2 path assumes out_features == 1"

    # ---- wrapper-side layout plumbing (no compute hoisting) ----
    # Flatten membership to [B, G, L*N]; build block-diagonal features
    # H_blk[b, l*N + n, l*F + f] = h[b, l, n, f] so that per-level pooling and
    # the lane-axis concat become one [G, L*N] @ [L*N, L*F] MXU matmul.
    a_flat = jnp.transpose(a, (0, 2, 1, 3)).reshape(B, G, L * N)
    eye = jnp.eye(L, dtype=h.dtype)
    h_blk = jnp.einsum("blnf,lm->blnmf", h, eye).reshape(B, L * N, L * F)

    w1t = w1.T                     # [L*F, F] -> lane-dense in-kernel matmul
    b1_2d = b1.reshape(1, F)       # [1, F] (VMEM, broadcast over sublanes)
    w2_row = w2.reshape(1, F)      # [1, F] (VPU multiply operand)
    b2_s = b2.reshape(1)           # [1]   scalar -> SMEM

    # TODO(synk): at realistic G/N/F, cast a_flat/h_blk/w1t to bf16 here
    # (keep preferred_element_type=f32) for native MXU rate on v6e/v7x.

    return pl.pallas_call(
        multipool_kernel,
        out_shape=jax.ShapeDtypeStruct((B, G, O), jnp.float32),
        grid=(B,),
        in_specs=[
            pl.BlockSpec((1, G, L * N), lambda b: (b, 0, 0)),       # A tile
            pl.BlockSpec((1, L * N, L * F), lambda b: (b, 0, 0)),   # H_blk tile
            pl.BlockSpec((L * F, F), lambda b: (0, 0)),             # W1^T resident
            pl.BlockSpec((1, F), lambda b: (0, 0)),                 # b1 resident
            pl.BlockSpec((1, F), lambda b: (0, 0)),                 # w2 row resident
            pl.BlockSpec(memory_space=pltpu.MemorySpace.SMEM),      # b2 scalar
        ],
        out_specs=pl.BlockSpec((1, G, O), lambda b: (b, 0, 0)),
        compiler_params=pltpu.CompilerParams(
            # Independent problem instances: parallel batch axis shards the
            # grid across both TensorCores on v7x (no-op on v5e/v6e).
            dimension_semantics=("parallel",),
        ),
    )(a_flat, h_blk, w1t, b1_2d, w2_row, b2_s)


def multipool_reference(a, h, w1, b1, w2, b2):
    """Pure-JAX reference mirroring the PyTorch forward (batched)."""
    pooled = jnp.einsum("blgn,blnf->blgf", a, h)                 # [B, L, G, F]
    B, L, G, F = pooled.shape
    cat = jnp.transpose(pooled, (0, 2, 1, 3)).reshape(B, G, L * F)
    hidden = jnp.tanh(cat @ w1.T + b1)
    return hidden @ w2.T + b2                                    # [B, G, O]


if __name__ == "__main__":
    key = jax.random.PRNGKey(0)
    k_a, k_h, k_w1, k_b1, k_w2, k_b2 = jax.random.split(key, 6)

    # Synthetic batch of "graphs": random 0/1 membership + node features.
    a = (jax.random.uniform(k_a, (BATCH, MAX_LEVEL, NUM_G, NUM_N)) > 0.5).astype(
        jnp.float32
    )
    h = jax.random.normal(
        k_h, (BATCH, MAX_LEVEL, NUM_N, IN_FEATURES), jnp.float32
    )

    # Deterministic parameter init (PyTorch Linear shapes: weight [out, in]).
    fan1 = MAX_LEVEL * IN_FEATURES
    lim1 = 1.0 / np.sqrt(fan1)
    w1 = jax.random.uniform(k_w1, (IN_FEATURES, fan1), jnp.float32, -lim1, lim1)
    b1 = jax.random.uniform(k_b1, (IN_FEATURES,), jnp.float32, -lim1, lim1)
    lim2 = 1.0 / np.sqrt(IN_FEATURES)
    w2 = jax.random.uniform(
        k_w2, (OUT_FEATURES, IN_FEATURES), jnp.float32, -lim2, lim2
    )
    b2 = jax.random.uniform(k_b2, (OUT_FEATURES,), jnp.float32, -lim2, lim2)

    out = multipool_forward(a, h, w1, b1, w2, b2)
    out = jax.block_until_ready(out)

    ref = multipool_reference(a, h, w1, b1, w2, b2)
    np.testing.assert_allclose(
        np.asarray(out), np.asarray(ref), rtol=1e-5, atol=1e-4
    )
    print("KERNEL_OK")
</pallas_src>

<mosaic_0001>
module attributes {stable_mosaic.version = 11 : i64} {
  func.func @multipool_kernel(%arg0: i32, %arg1: memref<1x8x64xf32, #tpu.memory_space<vmem>>, %arg2: memref<1x64x128xf32, #tpu.memory_space<vmem>>, %arg3: memref<128x32xf32, #tpu.memory_space<vmem>>, %arg4: memref<1x32xf32, #tpu.memory_space<vmem>>, %arg5: memref<1x32xf32, #tpu.memory_space<vmem>>, %arg6: memref<1xf32, #tpu.memory_space<smem>>, %arg7: memref<1x8x1xf32, #tpu.memory_space<vmem>>) attributes {dimension_semantics = [#tpu.dimension_semantics<parallel>], iteration_bounds = array<i64: 8>, scalar_prefetch = 0 : i64, scratch_operands = 0 : i64, tpu.core_type = #tpu.core_type<tc>, window_params = [{transform_indices = @transform_0, window_bounds = array<i64: 1, 8, 64>}, {transform_indices = @transform_1, window_bounds = array<i64: 1, 64, 128>}, {pipeline_mode = #tpu.pipeline_mode<synchronous>, transform_indices = @transform_2, window_bounds = array<i64: 128, 32>}, {pipeline_mode = #tpu.pipeline_mode<synchronous>, transform_indices = @transform_3, window_bounds = array<i64: 1, 32>}, {pipeline_mode = #tpu.pipeline_mode<synchronous>, transform_indices = @transform_4, window_bounds = array<i64: 1, 32>}, {transform_indices = @transform_5, window_bounds = array<i64: 1>}, {transform_indices = @transform_6, window_bounds = array<i64: 1, 8, 1>}]} {
    %c0 = arith.constant 0 : index
    %c0_0 = arith.constant 0 : index
    %c0_1 = arith.constant 0 : index
    %0 = vector.load %arg1[%c0, %c0_0, %c0_1] : memref<1x8x64xf32, #tpu.memory_space<vmem>>, vector<1x8x64xf32>
    %1 = vector.shape_cast %0 : vector<1x8x64xf32> to vector<8x64xf32>
    %c0_2 = arith.constant 0 : index
    %c0_3 = arith.constant 0 : index
    %c0_4 = arith.constant 0 : index
    %2 = vector.load %arg2[%c0_2, %c0_3, %c0_4] : memref<1x64x128xf32, #tpu.memory_space<vmem>>, vector<1x64x128xf32>
    %3 = vector.shape_cast %2 : vector<1x64x128xf32> to vector<64x128xf32>
    %cst = arith.constant dense<0.000000e+00> : vector<8x128xf32>
    %4 = tpu.matmul %1, %3, %cst {dimension_numbers = #tpu.dot_dimension_numbers<[1], [0], [0], [1], [0, 0, 1, 1], [], []>} : vector<8x64xf32>, vector<64x128xf32>, vector<8x128xf32> -> vector<8x128xf32>
    %c0_5 = arith.constant 0 : index
    %c0_6 = arith.constant 0 : index
    %5 = vector.load %arg3[%c0_5, %c0_6] : memref<128x32xf32, #tpu.memory_space<vmem>>, vector<128x32xf32>
    %cst_7 = arith.constant dense<0.000000e+00> : vector<8x32xf32>
    %6 = tpu.matmul %4, %5, %cst_7 {dimension_numbers = #tpu.dot_dimension_numbers<[1], [0], [0], [1], [0, 0, 1, 1], [], []>} : vector<8x128xf32>, vector<128x32xf32>, vector<8x32xf32> -> vector<8x32xf32>
    %c0_8 = arith.constant 0 : index
    %c0_9 = arith.constant 0 : index
    %7 = vector.load %arg4[%c0_8, %c0_9] : memref<1x32xf32, #tpu.memory_space<vmem>>, vector<1x32xf32>
    %8 = vector.broadcast %7 : vector<1x32xf32> to vector<8x32xf32>
    %9 = arith.addf %6, %8 : vector<8x32xf32>
    %10 = math.tanh %9 : vector<8x32xf32>
    %c0_10 = arith.constant 0 : index
    %c0_11 = arith.constant 0 : index
    %11 = vector.load %arg5[%c0_10, %c0_11] : memref<1x32xf32, #tpu.memory_space<vmem>>, vector<1x32xf32>
    %12 = vector.broadcast %11 : vector<1x32xf32> to vector<8x32xf32>
    %13 = arith.mulf %10, %12 : vector<8x32xf32>
    %cst_12 = arith.constant dense<0.000000e+00> : vector<8xf32>
    %14 = vector.multi_reduction <add>, %13, %cst_12 [1] : vector<8x32xf32> to vector<8xf32>
    %15 = vector.shape_cast %14 : vector<8xf32> to vector<8x1xf32>
    %c0_13 = arith.constant 0 : index
    %16 = memref.load %arg6[%c0_13] : memref<1xf32, #tpu.memory_space<smem>>
    %17 = vector.broadcast %16 : f32 to vector<8x1xf32>
    %18 = arith.addf %15, %17 : vector<8x1xf32>
    %c0_14 = arith.constant 0 : index
    %c0_15 = arith.constant 0 : index
    %c0_16 = arith.constant 0 : index
    %19 = vector.load %arg7[%c0_14, %c0_15, %c0_16] : memref<1x8x1xf32, #tpu.memory_space<vmem>>, vector<1x8x1xf32>
    %20 = vector.shape_cast %19 : vector<1x8x1xf32> to vector<8x1xf32>
    %21 = vector.shape_cast %18 : vector<8x1xf32> to vector<1x8x1xf32>
    tpu.vector_store %arg7[%c0_14, %c0_15, %c0_16], %21 {strides = array<i32>} : memref<1x8x1xf32, #tpu.memory_space<vmem>>, vector<1x8x1xf32>,
    return
  }
  func.func @transform_0(%arg0: i32) -> (i32, i32, i32) {
    %c0_i32 = arith.constant 0 : i32
    %c0_i32_0 = arith.constant 0 : i32
    %c0_i32_1 = arith.constant 0 : i32
    return %arg0, %c0_i32, %c0_i32_0 : i32, i32, i32
  }
  func.func @transform_1(%arg0: i32) -> (i32, i32, i32) {
    %c0_i32 = arith.constant 0 : i32
    %c0_i32_0 = arith.constant 0 : i32
    %c0_i32_1 = arith.constant 0 : i32
    return %arg0, %c0_i32, %c0_i32_0 : i32, i32, i32
  }
  func.func @transform_2(%arg0: i32) -> (i32, i32) {
    %c0_i32 = arith.constant 0 : i32
    %c0_i32_0 = arith.constant 0 : i32
    %c0_i32_1 = arith.constant 0 : i32
    return %c0_i32, %c0_i32_0 : i32, i32
  }
  func.func @transform_3(%arg0: i32) -> (i32, i32) {
    %c0_i32 = arith.constant 0 : i32
    %c0_i32_0 = arith.constant 0 : i32
    %c0_i32_1 = arith.constant 0 : i32
    return %c0_i32, %c0_i32_0 : i32, i32
  }
  func.func @transform_4(%arg0: i32) -> (i32, i32) {
    %c0_i32 = arith.constant 0 : i32
    %c0_i32_0 = arith.constant 0 : i32
    %c0_i32_1 = arith.constant 0 : i32
    return %c0_i32, %c0_i32_0 : i32, i32
  }
  func.func @transform_5(%arg0: i32) -> i32 {
    %c0_i32 = arith.constant 0 : i32
    %c0_i32_0 = arith.constant 0 : i32
    return %c0_i32 : i32
  }
  func.func @transform_6(%arg0: i32) -> (i32, i32, i32) {
    %c0_i32 = arith.constant 0 : i32
    %c0_i32_0 = arith.constant 0 : i32
    %c0_i32_1 = arith.constant 0 : i32
    return %arg0, %c0_i32, %c0_i32_0 : i32, i32, i32
  }
}

</mosaic_0001>

<bundles_post_ra>
// kernel: tpu_custom_call.1
= control target key start
LH: loop header
LB: loop body
LE: loop exit
PB: predicated region body
PF: predicated region fallthrough
CT: control target
= control target key end

     0   :  { %s1041_s0 = inlined_call_operand.vmem [shape: f32[8,8,64], index: 0, kind: input, shape index: {}]   ;;  %s1042_s1 = inlined_call_operand.hbm [shape: f32[8,64,128], index: 1, kind: input, shape index: {}]   ;;  %s1043_s2 = inlined_call_operand.vmem [shape: f32[128,32], index: 2, kind: input, shape index: {}]   ;;  %s1044_s3 = inlined_call_operand.vmem [shape: f32[1,32], index: 3, kind: input, shape index: {}]   ;;  %s1045_s4 = inlined_call_operand.vmem [shape: f32[1,32], index: 4, kind: input, shape index: {}]   ;;  %s1046_s5 = inlined_call_operand.<no memory space> [shape: f32[1], index: 5, kind: input, shape index: {}]   ;;  %s1047_s6 = inlined_call_operand.vmem [shape: f32[8,8,1], index: 6, kind: output, shape index: {}]  }
   0x1   :  { %11 = sst [smem:[#allocation2]] %s1046_s5 }
   0x2   :  { %12 = vsyncpa [#allocation4], 0 }
   0x3   :  { %14 = vsyncpa [#allocation4 + $0x1], 0  ;;  %s847_s23 = smov 0   ;;  %s849_s24 = smov 0  }
   0x4   :  { %s851_s25 = smov 0   ;;  %s853_s26 = smov 0  }
   0x5 LB: > { %s866_s5 = sadd.s32 4294967295, %s801_s26   ;;  %s869_s27 = sadd.s32 1, %s801_s26   ;;  %s801_s26 = sphi %s853_s26, %s1054_s26   ;;  %s797_s25 = sphi %s851_s25, %s1053_s25   ;;  %s793_s24 = sphi %s849_s24, %s1052_s24   ;;  %s789_s23 = sphi %s847_s23, %s1051_s23  }
   0x6   : > { %s50_s28 = ssub.s32 %s801_s26, %s869_s27  ;;  %s53_s29 = sadd.s32 1, %s797_s25 }
   0x7   : > { %p51_p0 = scmp.eq.s32.totalorder %s50_s28, 0  ;;  %p60_p1 = scmp.ne.s32.totalorder %s797_s25, %s793_s24 }
   0x8   : > { %p61_p2 = scmp.eq.s32.totalorder %s801_s26, 0  ;;  %p66_p3 = scmp.ne.s32.totalorder %s793_s24, %s789_s23 }
   0x9   : > { %s879_s30 = scalar_select %p51_p0, %s797_s25, %s53_s29  }
   0xa   : > { %p62_p4 = por %p61_p2, %p60_p1  ;;  %p67_p5 = scmp.eq.s32.totalorder %s866_s5, 0 }
   0xb   : > { %p697_p6 = scmp.lt.s32.totalorder %s801_s26, 8  ;;  %s219_s8 = sand.u32 1, %s797_s25  }
   0xc   : > { %p883_p7 = por %p67_p5, %p66_p3  ;;  %s562_s9 = sshll.u32 %s219_s8, 6 }
   0xd   : > { %s574_s10 = sshll.u32 %s801_s26, 10  ;;  %s223_s14 = scalar_lea.vmem [#allocation3], %s562_s9 }
   0xe   : > { %s892_s13 = scalar_lea.hbm %s1042_s1, %s574_s10  ;;  %s230_s15 = sshll.u32 %s223_s14, 4  ;;  %s894_s15 = int_to_ptr.vmem [resolvable:$true] %s230_s15 }
   0xf   : > { %p896_p8 = pnand %p697_p6, %p62_p4  ;;  %s901_s17 = scalar_lea.sflag [#allocation4], %s219_s8 }
  0x10   : > { %s737_s18 = scalar_lea.hbm %s892_s13, 1024  ;;  %s742_s21 = scalar_lea.hbm %s1042_s1, 8192 }
  0x11   : > { %p738_p10 = scmp.ne.s32.totalorder %s892_s13, %s737_s18  ;;  %p739_p11 = pneg %p896_p8 }
  0x12   : > { %p743_p0 = scmp.lt.u32.totalorder %s892_s13, %s1042_s1  ;;  %p744_p1 = scmp.lt.u32.totalorder %s742_s21, %s737_s18 }
  0x13   : > { %p740_p12 = pnand %p739_p11, %p738_p10  ;;  %p746_p3 = scmp.lt.u32.totalorder %s737_s18, %s892_s13 }
  0x14   : > { %p745_p2 = por %p744_p1, %p743_p0 }
  0x15   : > { %p741_p13 = pneg %p740_p12 }
  0x16   : > { %p747_p4 = por %p746_p3, %p745_p2 }
  0x18   : > { %p748_p5 = pnand %p747_p4, %p741_p13 }
  0x1a   : > { %751 = shalt.err (!%p748_p5)
}
  0x1b   : > { %s752_s28 = scalar_lea.vmem %s894_s15, 1024  ;;  %s803_s29 = smov [#allocation3]  }
  0x1c   : > { %p753_p6 = scmp.ne.s32.totalorder %s894_s15, %s752_s28  ;;  %s757_s8 = sshll.u32 %s803_s29, 4  ;;  %s758_s8 = int_to_ptr.vmem [resolvable:$false] %s757_s8 }
  0x1d   : > { %s759_s9 = scalar_lea.vmem %s758_s8, 2048  ;;  %p760_p9 = scmp.lt.s32.totalorder %s894_s15, %s758_s8 }
  0x1e   : > { %p755_p10 = pnand %p753_p6, %p739_p11  ;;  %p761_p0 = scmp.lt.s32.totalorder %s759_s9, %s752_s28 }
  0x20   : > { %p756_p12 = pneg %p755_p10  ;;  %p762_p1 = por %p761_p0, %p760_p9 }
  0x22   : > { %p763_p2 = pnand %p762_p1, %p756_p12 }
  0x24   : > { %766 = shalt.err (!%p763_p2)
}
  0x25   : > { %s804_s10 = smov 128   ;;  %s805_s11 = smov 8  }
  0x26   : > { %696 = dma.hbm_to_vmem [thread:$0]  (!%p896_p8), %s892_s13, 1024, %s894_s15, %s901_s17, %s804_s10, %s804_s10, %s805_s11  }
  0x27   : > { %p238_p11 = scmp.lt.s32.totalorder %s801_s26, 9  ;;  %p1050_p13 = scmp.ge.s32.totalorder %s801_s26, 1 }
  0x29   : > { %p239_p3 = pnand %p1050_p13, %p238_p11 }
  0x2a   : > { %s244_s12 = sand.u32 (!%p239_p3), 1, %s793_s24  }
  0x2b   : > { %242 = sbr.rel (%p239_p3) target bundleno = 654 (0x28e), region = 44  ;;  %s566_s14 = sshll.u32 (!%p239_p3), %s244_s12, 6 }
  0x2c   : > { %s245_s18 = scalar_lea.sflag (!%p239_p3), [#allocation4], %s244_s12  ;;  %s933_s19 = scalar_lea.vmem (!%p239_p3), [#allocation3], %s566_s14 }
  0x32   : > { %784 = dma.done.wait (%p883_p7), %s245_s18, 1024  }
  0x33   : > { %786 = vsyncadd (%p883_p7), %s245_s18, 4294966272  ;;  %v806_v0 = vmov 0.0|0.0   ;;  %vm807_vm0 = vmmov 0   ;;  %v808_v1 = vmov 0.0   ;;  %v289_v2 = vld [vmem:[%s933_s19] sm:$0xff]  ;;  %v290_v3 = vld [vmem:[%s933_s19 + $0x8] sm:$0xff] }
  0x34   : > { %655 = vmatprep.subr.bf16.mxu0 %v806_v0  ;;  %617 = vmatprep.mubr.msk.f32.mxu0 %vm807_vm0, %v808_v1  ;;  %v291_v4 = vld [vmem:[%s933_s19 + $0x10] sm:$0xff]  ;;  %v656_v5 = vpack.c.bf16 %v290_v3, %v289_v2  ;;  %v292_v6 = vld [vmem:[%s933_s19 + $0x18] sm:$0xff]  ;;  %p280_p7 = scmp.lt.s32.totalorder %s866_s5, 7  ;;  %v371_v8 = vld [vmem:[%s1043_s2] sm:$0xff]  ;;  %vm297_vm1 = vcmask 523264   ;;  %vm473_vm2 = vcmask 261120  }
  0x35   : > { %667 = vmatprep.subr.bf16.mxu1 %v806_v0  ;;  %652 = vmatprep.mubr.msk.f32.mxu1 %vm807_vm0, %v808_v1  ;;  %v659_v7 = vpack.c.bf16 %v292_v6, %v291_v4  ;;  %v372_v9 = vld [vmem:[%s1043_s2 + $0x8] sm:$0xff]  ;;  %v373_v10 = vld [vmem:[%s1043_s2 + $0x10] sm:$0xff]  ;;  %v293_v11 = vld [vmem:[%s933_s19 + $0x20] sm:$0xff]  ;;  %s477_s7 = sld [smem:[#allocation2]]  ;;  %vm480_vm3 = vcmask 7168  }
  0x36   : > { %657 = vmatpush3.bf16.msra.mxu0 %v656_v5  ;;  %v294_v12 = vld [vmem:[%s933_s19 + $0x28] sm:$0xff]  ;;  %v668_v13 = vpack.c.bf16 %v372_v9, %v371_v8  ;;  %v374_v14 = vld [vmem:[%s1043_s2 + $0x18] sm:$0xff]  ;;  %s1056_s5 = smov (!%p280_p7, %s866_s5), 7  ;;  %v375_v17 = vld [vmem:[%s1043_s2 + $0x20] sm:$0xff] }
  0x37   : > { %658 = vmatprep.subr.bf16.mxu0 %v806_v0  ;;  %v671_v15 = vpack.c.bf16 %v374_v14, %v373_v10  ;;  %v662_v16 = vpack.c.bf16 %v294_v12, %v293_v11  ;;  %v376_v18 = vld [vmem:[%s1043_s2 + $0x28] sm:$0xff]  ;;  %v295_v19 = vld [vmem:[%s933_s19 + $0x30] sm:$0xff]  ;;  %v296_v20 = vld [vmem:[%s933_s19 + $0x38] sm:$0xff]  ;;  %s567_s8 = sshll.u32 %s1056_s5, 3 }
  0x38   : > { %669 = vmatpush3.bf16.msra.mxu1 %v668_v13  ;;  %v674_v21 = vpack.c.bf16 %v376_v18, %v375_v17  ;;  %v665_v22 = vpack.c.bf16 %v296_v20, %v295_v19  ;;  %v377_v23 = vld [vmem:[%s1043_s2 + $0x30] sm:$0xff]  ;;  %v378_v24 = vld [vmem:[%s1043_s2 + $0x38] sm:$0xff]  ;;  %s283_s19 = scalar_lea.vmem %s1041_s0, %s567_s8  ;;  %v379_v27 = vld [vmem:[%s1043_s2 + $0x40] sm:$0xff]  ;;  %s287_s16 = scalar_lea.vmem %s1047_s6, %s567_s8 }
  0x39   : > { %670 = vmatprep.subr.bf16.mxu1 %v806_v0  ;;  %v677_v25 = vpack.c.bf16 %v378_v24, %v377_v23  ;;  %v288_v26 = vld [vmem:[%s283_s19] sm:$0xff]  ;;  %v380_v28 = vld [vmem:[%s1043_s2 + $0x48] sm:$0xff]  ;;  %v381_v30 = vld [vmem:[%s1043_s2 + $0x50] sm:$0xff] }
  0x3a   : > { %660 = vmatpush3.bf16.msra.mxu0 %v659_v7  ;;  %v680_v29 = vpack.c.bf16 %v380_v28, %v379_v27  ;;  %v382_v31 = vld [vmem:[%s1043_s2 + $0x58] sm:$0xff]  ;;  %v383_v33 = vld [vmem:[%s1043_s2 + $0x60] sm:$0xff]  ;;  %v384_v34 = vld [vmem:[%s1043_s2 + $0x68] sm:$0xff] }
  0x3b   : > { %661 = vmatprep.subr.bf16.mxu0 %v806_v0  ;;  %v683_v32 = vpack.c.bf16 %v382_v31, %v381_v30  ;;  %v686_v35 = vpack.c.bf16 %v384_v34, %v383_v33  ;;  %v385_v36 = vld [vmem:[%s1043_s2 + $0x70] sm:$0xff]  ;;  %v386_v37 = vld [vmem:[%s1043_s2 + $0x78] sm:$0xff]  ;;  %v570_v41 = vld [vmem:[%s1044_s3] ss:$0 sm:$0xff]  ;;  %v478_v49 = vstv %s477_s7 }
  0x3c   : > { %672 = vmatpush3.bf16.msra.mxu1 %v671_v15  ;;  %v689_v38 = vpack.c.bf16 %v386_v37, %v385_v36  ;;  %v571_v45 = vld [vmem:[%s1045_s4] ss:$0 sm:$0xff] }
  0x3d   : > { %673 = vmatprep.subr.bf16.mxu1 %v806_v0 }
  0x3e   : > { %663 = vmatpush3.bf16.msra.mxu0 %v662_v16 }
  0x3f   : > { %664 = vmatprep.subr.bf16.mxu0 %v806_v0 }
  0x40   : > { %675 = vmatpush3.bf16.msra.mxu1 %v674_v21 }
  0x41   : > { %676 = vmatprep.subr.bf16.mxu1 %v806_v0 }
  0x42   : > { %666 = vmatpush3.bf16.msra.mxu0 %v665_v22 }
  0x44   : > { %678 = vmatpush3.bf16.msra.mxu1 %v677_v25 }
  0x45   : > { %618 = vmatmul.mubr.msk.f32.vlgmr.msra.gmra.mrb[0].mxu0 %vm297_vm1, %v288_v26  ;;  %679 = vmatprep.subr.bf16.mxu1 %v806_v0 }
  0x48   : > { %681 = vmatpush3.bf16.msra.mxu1 %v680_v29 }
  0x49   : > { %682 = vmatprep.subr.bf16.mxu1 %v806_v0 }
  0x4c   : > { %684 = vmatpush3.bf16.msra.mxu1 %v683_v32 }
  0x4d   : > { %685 = vmatprep.subr.bf16.mxu1 %v806_v0 }
  0x50   : > { %687 = vmatpush3.bf16.msra.mxu1 %v686_v35 }
  0x51   : > { %688 = vmatprep.subr.bf16.mxu1 %v806_v0 }
  0x54   : > { %690 = vmatpush3.bf16.msra.mxu1 %v689_v38 }
 0x118   : > { %v367_v39 = vpop.f32.mrb[0].mxu0 }
 0x119   : > { %v619_v40 = vpop.f32.mrb[1].mxu0  ;;  %653 = vmatmul.mubr.f32.vlgmr.msra.gmra.mrb[0].mxu1 %v367_v39 }
 0x1ec   : > { %v460_v42 = vpop.f32.mrb[0].mxu1 }
 0x1ed   : > { %v461_v43 = vadd.f32 %v570_v41, %v460_v42  ;;  %v654_v44 = vpop.f32.mrb[1].mxu1 }
 0x1ef   : > { %735 = vtanh.f32 %v461_v43 }
 0x1f9   : > { %v736_v46 = vpop.eup %735 }
 0x1fa   : > { %v472_v47 = vmul.f32 %v736_v46, %v571_v45 }
 0x1fc   : > { %v474_v48 = vsel %vm473_vm2, %v472_v47, 0.0 }
 0x1fd   : > { %475 = vadd.xlane.f32.xlu0 %v474_v48 }
 0x28a   : > { %v476_v50 = vpop.xlane.xlu0 %475 }
 0x28b   : > { %v479_v51 = vadd.f32 %v478_v49, %v476_v50 }
 0x28d   : > { %481 = vst.msk [vmem:[%s287_s16] sm:$0xff] %vm480_vm3, %v479_v51 }
 0x28e PF: > { %p17_p8 = scmp.ge.s32.totalorder %s869_s27, 10   ;;  %s1051_s23 = smov %s793_s24 }
 0x28f   : > { %s1052_s24 = smov %s797_s25  ;;  %s1053_s25 = smov %s879_s30 }
 0x290   : > { %s1054_s26 = smov %s869_s27  ;;  %19 = sbr.rel (!%p17_p8) target bundleno = 5 (0x5), region = 87 }
 0x297   :  { %501 = vsyncpa [#allocation4], 1 }
 0x298   :  { %503 = vsyncpa [#allocation4 + $0x1], 1 }

</bundles_post_ra>
